<compile_context>
chip_gen: v7x
topology: tpu7x:2x2x1
jax: 0.10.0
libtpu: 0.0.40
codegen_flags: <defaults>
</compile_context>

<pallas_src>
import functools

import jax
import jax.numpy as jnp
from jax.experimental import pallas as pl
from jax.experimental.pallas import tpu as pltpu


def _triplet_kernel(a_ref, p_ref, n_ref, out_ref, *,
                    margin, pack, feat, np_rows, tile_rows):
    """One batch tile: squared L2 via MXU segment-sum -> hinge -> block sum."""
    a = a_ref[...].astype(jnp.float32)          # (tile, lanes)
    p = p_ref[...].astype(jnp.float32)
    n = n_ref[...].astype(jnp.float32)

    dap = a - p
    dan = a - n
    sq_ap = dap * dap                           # dense VPU work over all lanes
    sq_an = dan * dan

    lanes = pack * feat
    # Constant one-hot segment matrix (lanes, pack): column j selects the lane
    # range of packed original row j.  The lane reduction runs on the MXU.
    lane_idx = jax.lax.broadcasted_iota(jnp.int32, (lanes, pack), 0)
    seg_idx = jax.lax.broadcasted_iota(jnp.int32, (lanes, pack), 1)
    lo = seg_idx * feat
    seg = ((lane_idx >= lo) & (lane_idx < lo + feat)).astype(jnp.float32)

    s_ap = jnp.dot(sq_ap, seg, preferred_element_type=jnp.float32)  # (tile, pack)
    s_an = jnp.dot(sq_an, seg, preferred_element_type=jnp.float32)

    hinge = jnp.maximum(jnp.sqrt(s_ap) - jnp.sqrt(s_an) + margin, 0.0)

    if np_rows % tile_rows != 0:
        # cdiv grid: the last block carries padded (garbage) rows -> mask them.
        row0 = pl.program_id(0) * tile_rows
        rid = row0 + jax.lax.broadcasted_iota(jnp.int32, hinge.shape, 0)
        hinge = jnp.where(rid < np_rows, hinge, 0.0)

    partial = jnp.sum(hinge)
    # Lane-dense, unmasked (8, 128) store of this block's partial sum.
    out_ref[...] = jnp.broadcast_to(partial, out_ref.shape).astype(out_ref.dtype)


def _pick_pack(N, D):
    """How many rows to fold into the lane axis (free row-major reshape)."""
    if D >= 128:
        return 1
    for k in range(1, 9):                       # smallest lane-dense pack
        if N % k == 0 and (k * D) % 128 == 0:
            return k
    best = 1                                    # fallback: best lane fill <= 128
    for k in range(2, 9):
        if N % k == 0 and k * D <= 128:
            best = k
    return best


def _sublane_multiple(dtype):
    # 8 rows for f32, 16 for bf16, 32 for int8/fp8.
    return max(8, 32 // jnp.dtype(dtype).itemsize)


def _default_vmem_limit():
    """Generation-aware scoped-VMEM budget (headroom under physical VMEM)."""
    try:
        info = pltpu.get_tpu_info()
        cap = int(getattr(info, "vmem_capacity_bytes", 0)) or 64 * 1024 * 1024
    except Exception:                           # query unavailable
        cap = 64 * 1024 * 1024
    # ~48 MiB on v7x (64 MiB physical), 96 MiB on v5e/v6e (128 MiB physical).
    return min((cap * 3) // 4, 96 * 1024 * 1024)


def triplet_loss(anchor, positive, negative, *, margin=1.0,
                 max_tile_rows=8192, vmem_limit_bytes=None):
    """Scalar mean triplet loss matching the PyTorch module's forward."""
    N, D = anchor.shape
    assert positive.shape == (N, D) and negative.shape == (N, D)
    if vmem_limit_bytes is None:
        vmem_limit_bytes = _default_vmem_limit()

    # ---- lane packing: fold rows into lanes when D < 128 (free reshape) ----
    pack = _pick_pack(N, D)
    np_rows, lanes = N // pack, D * pack
    if pack > 1:
        anchor = anchor.reshape(np_rows, lanes)      # row-major: metadata only
        positive = positive.reshape(np_rows, lanes)
        negative = negative.reshape(np_rows, lanes)

    # ---- batch tile: biggest row count fitting the VMEM budget -------------
    itemsize = anchor.dtype.itemsize
    lane_padded = pl.cdiv(lanes, 128) * 128
    # 3 inputs x 2 pipeline buffers + ~4 tile-sized f32 temporaries in-kernel.
    bytes_per_row = 3 * 2 * lane_padded * itemsize + 4 * lane_padded * 4
    cap_rows = max(1, (vmem_limit_bytes * 4 // 5) // bytes_per_row)
    sub = _sublane_multiple(anchor.dtype)

    tile_rows = min(np_rows, cap_rows, max_tile_rows)
    if tile_rows < np_rows:
        tile_rows = max(sub, (tile_rows // sub) * sub)   # dtype-aware alignment
    num_blocks = pl.cdiv(np_rows, tile_rows)

    # Give v7x's two TensorCores at least two blocks to shard over.
    if num_blocks < 2 and np_rows > sub:
        half = max(sub, pl.cdiv(pl.cdiv(np_rows, 2), sub) * sub)
        if half < np_rows:
            tile_rows = half
            num_blocks = pl.cdiv(np_rows, tile_rows)

    kernel = functools.partial(
        _triplet_kernel, margin=float(margin), pack=pack, feat=D,
        np_rows=np_rows, tile_rows=tile_rows)

    in_spec = pl.BlockSpec((tile_rows, lanes), lambda i: (i, 0))
    cost = pl.CostEstimate(
        flops=8 * N * D,
        transcendentals=2 * N,
        bytes_accessed=3 * N * D * itemsize + num_blocks * 8 * 128 * 4,
    )

    partials = pl.pallas_call(
        kernel,
        out_shape=jax.ShapeDtypeStruct((num_blocks, 8, 128), jnp.float32),
        grid_spec=pltpu.PrefetchScalarGridSpec(
            num_scalar_prefetch=0,
            grid=(num_blocks,),
            in_specs=[in_spec, in_spec, in_spec],
            out_specs=pl.BlockSpec((1, 8, 128), lambda i: (i, 0, 0)),
        ),
        compiler_params=pltpu.CompilerParams(
            dimension_semantics=("parallel",),
            vmem_limit_bytes=vmem_limit_bytes,
        ),
        cost_estimate=cost,
    )(anchor, positive, negative)

    # Each block wrote its partial sum broadcast over its (8, 128) tile.
    return jnp.sum(partials[:, 0, 0]) / jnp.float32(N)


if __name__ == "__main__":
    key = jax.random.PRNGKey(0)
    k1, k2, k3, k4, k5, k6 = jax.random.split(key, 6)

    def ref_loss(a, p, n, margin=1.0):
        d_ap = jnp.sqrt(jnp.sum((a - p) ** 2, axis=1))
        d_an = jnp.sqrt(jnp.sum((a - n) ** 2, axis=1))
        return jnp.mean(jnp.maximum(d_ap - d_an + margin, 0.0))

    # Small embeddings: 16 triplets, 32-dim features (pack=4 -> 128 lanes).
    N, D = 16, 32
    a = jax.random.normal(k1, (N, D), dtype=jnp.float32)
    p = jax.random.normal(k2, (N, D), dtype=jnp.float32)
    n = jax.random.normal(k3, (N, D), dtype=jnp.float32)
    loss = jax.block_until_ready(triplet_loss(a, p, n, margin=1.0))
    assert jnp.allclose(loss, ref_loss(a, p, n), atol=1e-5, rtol=1e-5), (
        loss, ref_loss(a, p, n))

    # Awkward batch size: exercises the cdiv grid + in-kernel tail masking.
    N2, D2 = 36, 128
    a2 = jax.random.normal(k4, (N2, D2), dtype=jnp.float32)
    p2 = jax.random.normal(k5, (N2, D2), dtype=jnp.float32)
    n2 = jax.random.normal(k6, (N2, D2), dtype=jnp.float32)
    loss2 = jax.block_until_ready(triplet_loss(a2, p2, n2, margin=1.0))
    assert jnp.allclose(loss2, ref_loss(a2, p2, n2), atol=1e-5, rtol=1e-5), (
        loss2, ref_loss(a2, p2, n2))

    print("KERNEL_OK")
</pallas_src>

<mosaic_0001>
module attributes {stable_mosaic.version = 11 : i64} {
  func.func @_triplet_kernel(%arg0: i32, %arg1: memref<4x128xf32, #tpu.memory_space<vmem>>, %arg2: memref<4x128xf32, #tpu.memory_space<vmem>>, %arg3: memref<4x128xf32, #tpu.memory_space<vmem>>, %arg4: memref<1x8x128xf32, #tpu.memory_space<vmem>>) attributes {dimension_semantics = [#tpu.dimension_semantics<parallel>], iteration_bounds = array<i64: 1>, scalar_prefetch = 0 : i64, scratch_operands = 0 : i64, tpu.core_type = #tpu.core_type<tc>, window_params = [{transform_indices = @transform_0, window_bounds = array<i64: 4, 128>}, {transform_indices = @transform_1, window_bounds = array<i64: 4, 128>}, {transform_indices = @transform_2, window_bounds = array<i64: 4, 128>}, {transform_indices = @transform_3, window_bounds = array<i64: 1, 8, 128>}]} {
    %c0 = arith.constant 0 : index
    %c0_0 = arith.constant 0 : index
    %0 = vector.load %arg1[%c0, %c0_0] : memref<4x128xf32, #tpu.memory_space<vmem>>, vector<4x128xf32>
    %c0_1 = arith.constant 0 : index
    %c0_2 = arith.constant 0 : index
    %1 = vector.load %arg2[%c0_1, %c0_2] : memref<4x128xf32, #tpu.memory_space<vmem>>, vector<4x128xf32>
    %c0_3 = arith.constant 0 : index
    %c0_4 = arith.constant 0 : index
    %2 = vector.load %arg3[%c0_3, %c0_4] : memref<4x128xf32, #tpu.memory_space<vmem>>, vector<4x128xf32>
    %3 = arith.subf %0, %1 : vector<4x128xf32>
    %4 = arith.subf %0, %2 : vector<4x128xf32>
    %5 = arith.mulf %3, %3 : vector<4x128xf32>
    %6 = arith.mulf %4, %4 : vector<4x128xf32>
    %7 = tpu.iota {dimensions = array<i32: 0>} : vector<128x4xi32>
    %8 = tpu.iota {dimensions = array<i32: 1>} : vector<128x4xi32>
    %c32_i32 = arith.constant 32 : i32
    %9 = vector.broadcast %c32_i32 : i32 to vector<128x4xi32>
    %10 = arith.muli %8, %9 : vector<128x4xi32>
    %11 = arith.cmpi sge, %7, %10 : vector<128x4xi32>
    %c32_i32_5 = arith.constant 32 : i32
    %12 = vector.broadcast %c32_i32_5 : i32 to vector<128x4xi32>
    %13 = arith.addi %10, %12 : vector<128x4xi32>
    %14 = arith.cmpi slt, %7, %13 : vector<128x4xi32>
    %15 = arith.andi %11, %14 : vector<128x4xi1>
    %16 = arith.extui %15 : vector<128x4xi1> to vector<128x4xi32>
    %17 = arith.sitofp %16 : vector<128x4xi32> to vector<128x4xf32>
    %cst = arith.constant dense<0.000000e+00> : vector<4x4xf32>
    %18 = tpu.matmul %5, %17, %cst {dimension_numbers = #tpu.dot_dimension_numbers<[1], [0], [0], [1], [0, 0, 1, 1], [], []>} : vector<4x128xf32>, vector<128x4xf32>, vector<4x4xf32> -> vector<4x4xf32>
    %cst_6 = arith.constant dense<0.000000e+00> : vector<4x4xf32>
    %19 = tpu.matmul %6, %17, %cst_6 {dimension_numbers = #tpu.dot_dimension_numbers<[1], [0], [0], [1], [0, 0, 1, 1], [], []>} : vector<4x128xf32>, vector<128x4xf32>, vector<4x4xf32> -> vector<4x4xf32>
    %20 = math.sqrt %18 : vector<4x4xf32>
    %21 = math.sqrt %19 : vector<4x4xf32>
    %22 = arith.subf %20, %21 : vector<4x4xf32>
    %cst_7 = arith.constant 1.000000e+00 : f32
    %23 = vector.broadcast %cst_7 : f32 to vector<4x4xf32>
    %24 = arith.addf %22, %23 : vector<4x4xf32>
    %cst_8 = arith.constant 0.000000e+00 : f32
    %25 = vector.broadcast %cst_8 : f32 to vector<4x4xf32>
    %26 = arith.maximumf %24, %25 : vector<4x4xf32>
    %27 = vector.shape_cast %26 : vector<4x4xf32> to vector<1x4x4xf32>
    %cst_9 = arith.constant dense<0.000000e+00> : vector<1xf32>
    %28 = vector.multi_reduction <add>, %27, %cst_9 [1, 2] : vector<1x4x4xf32> to vector<1xf32>
    %29 = vector.shape_cast %28 : vector<1xf32> to vector<1x1x1xf32>
    %30 = vector.extract %29[0, 0, 0] : f32 from vector<1x1x1xf32>
    %31 = vector.broadcast %30 : f32 to vector<1x8x128xf32>
    %c0_10 = arith.constant 0 : index
    %c0_11 = arith.constant 0 : index
    %c0_12 = arith.constant 0 : index
    %32 = vector.load %arg4[%c0_10, %c0_11, %c0_12] : memref<1x8x128xf32, #tpu.memory_space<vmem>>, vector<1x8x128xf32>
    tpu.vector_store %arg4[%c0_10, %c0_11, %c0_12], %31 {strides = array<i32>} : memref<1x8x128xf32, #tpu.memory_space<vmem>>, vector<1x8x128xf32>,
    return
  }
  func.func @transform_0(%arg0: i32) -> (i32, i32) {
    %c0_i32 = arith.constant 0 : i32
    %c0_i32_0 = arith.constant 0 : i32
    return %arg0, %c0_i32 : i32, i32
  }
  func.func @transform_1(%arg0: i32) -> (i32, i32) {
    %c0_i32 = arith.constant 0 : i32
    %c0_i32_0 = arith.constant 0 : i32
    return %arg0, %c0_i32 : i32, i32
  }
  func.func @transform_2(%arg0: i32) -> (i32, i32) {
    %c0_i32 = arith.constant 0 : i32
    %c0_i32_0 = arith.constant 0 : i32
    return %arg0, %c0_i32 : i32, i32
  }
  func.func @transform_3(%arg0: i32) -> (i32, i32, i32) {
    %c0_i32 = arith.constant 0 : i32
    %c0_i32_0 = arith.constant 0 : i32
    %c0_i32_1 = arith.constant 0 : i32
    return %arg0, %c0_i32, %c0_i32_0 : i32, i32, i32
  }
}

</mosaic_0001>

<bundles_post_ra>
// kernel: tpu_custom_call.1
= control target key start
LH: loop header
LB: loop body
LE: loop exit
PB: predicated region body
PF: predicated region fallthrough
CT: control target
= control target key end

     0   :  { %8 = vsyncpa [#allocation3], 0  ;;  %s838_s0 = inlined_call_operand.hbm [shape: f32[4,128], index: 0, kind: input, shape index: {}]   ;;  %s839_s1 = inlined_call_operand.hbm [shape: f32[4,128], index: 1, kind: input, shape index: {}]   ;;  %s840_s2 = inlined_call_operand.vmem [shape: f32[4,128], index: 2, kind: input, shape index: {}]   ;;  %s841_s3 = inlined_call_operand.hbm [shape: f32[1,8,128], index: 3, kind: output, shape index: {}]  }
   0x1   :  { %9 = vsyncpa [#allocation6], 0 }
   0x2   :  { %10 = vsyncpa [#allocation4], 0  ;;  %s618_s12 = smov [#allocation2]   ;;  %s619_s14 = smov [#allocation5]  }
   0x3   :  { %s17_s13 = sshll.u32 %s618_s12, 4  ;;  %s27_s15 = sshll.u32 %s619_s14, 4  ;;  %s18_s13 = int_to_ptr.vmem [resolvable:$true] %s17_s13  ;;  %s28_s15 = int_to_ptr.vmem [resolvable:$true] %s27_s15 }
   0x4   :  { %s546_s18 = scalar_lea.hbm %s838_s0, 64 }
   0x5   :  { %p547_p0 = scmp.ne.s32.totalorder %s838_s0, %s546_s18  ;;  %p550_p1 = scmp.lt.u32.totalorder %s546_s18, %s838_s0 }
   0x7   :  { %p552_p2 = pnand %p550_p1, %p547_p0 }
   0x9   :  { %555 = shalt.err (!%p552_p2)
}
   0xa   :  { %s556_s23 = scalar_lea.vmem %s18_s13, 64  ;;  %p561_p4 = scmp.lt.s32.totalorder %s18_s13, %s18_s13 }
   0xb   :  { %p557_p3 = scmp.ne.s32.totalorder %s18_s13, %s556_s23  ;;  %p562_p5 = scmp.lt.s32.totalorder %s556_s23, %s556_s23 }
   0xd   :  { %p563_p6 = por %p562_p5, %p561_p4 }
   0xf   :  { %p564_p7 = pnand %p563_p6, %p557_p3 }
  0x11   :  { %567 = shalt.err (!%p564_p7)
}
  0x12   :  { %20 = dma.hbm_to_vmem [thread:$0]  %s838_s0, 64, %s18_s13, [#allocation3]  }
  0x13   :  { %s568_s28 = scalar_lea.hbm %s839_s1, 64 }
  0x14   :  { %p569_p8 = scmp.ne.s32.totalorder %s839_s1, %s568_s28  ;;  %p572_p9 = scmp.lt.u32.totalorder %s568_s28, %s839_s1 }
  0x16   :  { %p574_p10 = pnand %p572_p9, %p569_p8 }
  0x18   :  { %577 = shalt.err (!%p574_p10)
}
  0x19   :  { %s578_s6 = scalar_lea.vmem %s28_s15, 64  ;;  %p583_p12 = scmp.lt.s32.totalorder %s28_s15, %s28_s15 }
  0x1a   :  { %p579_p11 = scmp.ne.s32.totalorder %s28_s15, %s578_s6  ;;  %p584_p13 = scmp.lt.s32.totalorder %s578_s6, %s578_s6 }
  0x1c   :  { %p585_p0 = por %p584_p13, %p583_p12 }
  0x1e   :  { %p586_p1 = pnand %p585_p0, %p579_p11 }
  0x20   :  { %589 = shalt.err (!%p586_p1)
}
  0x21   :  { %30 = dma.hbm_to_vmem [thread:$0]  %s839_s1, 64, %s28_s15, [#allocation6]  }
  0x22   :  { %612 = dma.done.wait [#allocation3], 64  }
  0x23   :  { %613 = vsyncadd [#allocation3], 4294967232  ;;  %v46_v0 = vlaneseq }
  0x24   :  { %614 = dma.done.wait [#allocation6], 64  }
  0x25   :  { %615 = vsyncadd [#allocation6], 4294967232  ;;  %v620_v1 = vmov 0.0|0.0   ;;  %v671_v2 = vshrl.u32 %v46_v0, 7  ;;  %v64_v3 = vand.u32 127, %v46_v0  ;;  %vm621_vm0 = vmmov 0  }
  0x26   :  { %485 = vmatprep.subr.bf16.mxu0 %v620_v1  ;;  %509 = vmatprep.subr.bf16.mxu1 %v620_v1  ;;  %v622_v4 = vmov 0.0   ;;  %v623_v13 = vmov 1.0|1.0   ;;  %v39_v34 = vld [vmem:[#allocation2] sm:$0xf] }
  0x27   :  { %447 = vmatprep.mubr.msk.f32.mxu0 %vm621_vm0, %v622_v4  ;;  %482 = vmatprep.mubr.msk.f32.mxu1 %vm621_vm0, %v622_v4  ;;  %v48_v5 = vadd.s32 8, %v671_v2  ;;  %v674_v6 = vmul.u32 32, %v64_v3  ;;  %v49_v7 = vadd.s32 16, %v671_v2  ;;  %v50_v9 = vadd.s32 24, %v671_v2  ;;  %v40_v35 = vld [vmem:[#allocation5] sm:$0xf] }
  0x28   :  { %v51_v10 = vadd.s32 32, %v671_v2  ;;  %v52_v11 = vadd.s32 40, %v671_v2  ;;  %v53_v12 = vadd.s32 48, %v671_v2  ;;  %v54_v15 = vadd.s32 56, %v671_v2  ;;  %v41_v36 = vld [vmem:[%s840_s2] sm:$0xf] }
  0x29   :  { %vm66_vm1 = vcmp.ge.s32.totalorder %v671_v2, %v674_v6  ;;  %v680_v8 = vadd.s32 32, %v674_v6  ;;  %vm67_vm2 = vcmp.ge.s32.totalorder %v48_v5, %v674_v6  ;;  %vm68_vm6 = vcmp.ge.s32.totalorder %v49_v7, %v674_v6  ;;  %s624_s2 = smov [#allocation7]  }
  0x2a   :  { %vm69_vm9 = vcmp.ge.s32.totalorder %v50_v9, %v674_v6  ;;  %vm70_vm13 = vcmp.ge.s32.totalorder %v51_v10, %v674_v6  ;;  %vm71_vm0 = vcmp.ge.s32.totalorder %v52_v11, %v674_v6  ;;  %v55_v16 = vadd.s32 64, %v671_v2  ;;  %s323_s9 = sshll.u32 %s624_s2, 4  ;;  %s324_s9 = int_to_ptr.vmem [resolvable:$true] %s323_s9 }
  0x2b   :  { %vm83_vm3 = vcmp.lt.s32.totalorder %v671_v2, %v680_v8  ;;  %vm84_vm4 = vcmp.lt.s32.totalorder %v48_v5, %v680_v8  ;;  %vm85_vm7 = vcmp.lt.s32.totalorder %v49_v7, %v680_v8  ;;  %vm86_vm10 = vcmp.lt.s32.totalorder %v50_v9, %v680_v8  ;;  %s590_s11 = scalar_lea.vmem %s324_s9, 128  ;;  %p595_p3 = scmp.lt.s32.totalorder %s324_s9, %s324_s9 }
  0x2c   :  { %vm99_vm5 = vmand %vm66_vm1, %vm83_vm3  ;;  %vm87_vm14 = vcmp.lt.s32.totalorder %v51_v10, %v680_v8  ;;  %vm88_vm1 = vcmp.lt.s32.totalorder %v52_v11, %v680_v8  ;;  %v56_v18 = vadd.s32 72, %v671_v2  ;;  %v57_v20 = vadd.s32 80, %v671_v2  ;;  %p591_p2 = scmp.ne.s32.totalorder %s324_s9, %s590_s11  ;;  %p596_p4 = scmp.lt.s32.totalorder %s590_s11, %s590_s11 }
  0x2d   :  { %vm100_vm8 = vmand %vm67_vm2, %vm84_vm4  ;;  %vm72_vm4 = vcmp.ge.s32.totalorder %v53_v12, %v674_v6  ;;  %v58_v22 = vadd.s32 88, %v671_v2  ;;  %v59_v25 = vadd.s32 96, %v671_v2  ;;  %v60_v27 = vadd.s32 104, %v671_v2 }
  0x2e   :  { %vm486_vm11 = vmpackc.low %vm100_vm8, %vm99_vm5  ;;  %vm89_vm5 = vcmp.lt.s32.totalorder %v53_v12, %v680_v8  ;;  %vm90_vm8 = vcmp.lt.s32.totalorder %v54_v15, %v680_v8  ;;  %v61_v30 = vadd.s32 112, %v671_v2  ;;  %v62_v31 = vadd.s32 120, %v671_v2  ;;  %p597_p5 = por %p596_p4, %p595_p3 }
  0x2f   :  { %487 = vmatpush3.bf16.msk.msra.mxu0 %vm486_vm11, %v623_v13  ;;  %511 = vmatpush3.bf16.msk.msra.mxu1 %vm486_vm11, %v623_v13  ;;  %vm696_vm12 = vmand %vm68_vm6, %vm85_vm7  ;;  %vm73_vm7 = vcmp.ge.s32.totalorder %v54_v15, %v674_v6  ;;  %vm74_vm11 = vcmp.ge.s32.totalorder %v55_v16, %v674_v6  ;;  %v42_v37 = vsub.f32 %v39_v34, %v40_v35 }
  0x30   :  { %488 = vmatprep.subr.bf16.mxu0 %v620_v1  ;;  %512 = vmatprep.subr.bf16.mxu1 %v620_v1  ;;  %vm102_vm15 = vmand %vm69_vm9, %vm86_vm10  ;;  %v43_v38 = vsub.f32 %v39_v34, %v41_v36  ;;  %p598_p6 = pnand %p597_p5, %p591_p2 }
  0x31   :  { %vm489_vm2 = vmpackc.low %vm102_vm15, %vm696_vm12  ;;  %vm91_vm12 = vcmp.lt.s32.totalorder %v55_v16, %v680_v8  ;;  %vm92_vm15 = vcmp.lt.s32.totalorder %v56_v18, %v680_v8  ;;  %v44_v39 = vmul.f32 %v42_v37, %v42_v37 }
  0x32   :  { %vm710_vm3 = vmand %vm70_vm13, %vm87_vm14  ;;  %vm75_vm14 = vcmp.ge.s32.totalorder %v56_v18, %v674_v6  ;;  %v45_v40 = vmul.f32 %v43_v38, %v43_v38 }
  0x33   :  { %490 = vmatpush3.bf16.msk.msra.mxu0 %vm489_vm2, %v623_v13  ;;  %514 = vmatpush3.bf16.msk.msra.mxu1 %vm489_vm2, %v623_v13  ;;  %vm719_vm6 = vmand %vm71_vm0, %vm88_vm1  ;;  %vm76_vm2 = vcmp.ge.s32.totalorder %v57_v20, %v674_v6 }
  0x34   :  { %491 = vmatprep.subr.bf16.mxu0 %v620_v1  ;;  %515 = vmatprep.subr.bf16.mxu1 %v620_v1  ;;  %vm492_vm9 = vmpackc.low %vm719_vm6, %vm710_vm3  ;;  %vm93_vm3 = vcmp.lt.s32.totalorder %v57_v20, %v680_v8  ;;  %vm94_vm6 = vcmp.lt.s32.totalorder %v58_v22, %v680_v8 }
  0x35   :  { %vm732_vm10 = vmand %vm72_vm4, %vm89_vm5  ;;  %vm77_vm5 = vcmp.ge.s32.totalorder %v58_v22, %v674_v6 }
  0x36   :  { %vm739_vm13 = vmand %vm73_vm7, %vm90_vm8 }
  0x37   :  { %493 = vmatpush3.bf16.msk.msra.mxu0 %vm492_vm9, %v623_v13  ;;  %517 = vmatpush3.bf16.msk.msra.mxu1 %vm492_vm9, %v623_v13  ;;  %vm495_vm0 = vmpackc.low %vm739_vm13, %vm732_vm10  ;;  %vm78_vm10 = vcmp.ge.s32.totalorder %v59_v25, %v674_v6  ;;  %vm96_vm13 = vcmp.lt.s32.totalorder %v60_v27, %v680_v8 }
  0x38   :  { %494 = vmatprep.subr.bf16.mxu0 %v620_v1  ;;  %518 = vmatprep.subr.bf16.mxu1 %v620_v1  ;;  %vm753_vm1 = vmand %vm74_vm11, %vm91_vm12  ;;  %vm95_vm11 = vcmp.lt.s32.totalorder %v59_v25, %v680_v8  ;;  %vm79_vm12 = vcmp.ge.s32.totalorder %v60_v27, %v674_v6 }
  0x39   :  { %vm760_vm4 = vmand %vm75_vm14, %vm92_vm15 }
  0x3a   :  { %vm498_vm7 = vmpackc.low %vm760_vm4, %vm753_vm1  ;;  %vm80_vm1 = vcmp.ge.s32.totalorder %v61_v30, %v674_v6  ;;  %vm98_vm4 = vcmp.lt.s32.totalorder %v62_v31, %v680_v8 }
  0x3b   :  { %496 = vmatpush3.bf16.msk.msra.mxu0 %vm495_vm0, %v623_v13  ;;  %520 = vmatpush3.bf16.msk.msra.mxu1 %vm495_vm0, %v623_v13  ;;  %vm773_vm8 = vmand %vm76_vm2, %vm93_vm3  ;;  %vm97_vm2 = vcmp.lt.s32.totalorder %v61_v30, %v680_v8  ;;  %vm81_vm3 = vcmp.ge.s32.totalorder %v62_v31, %v674_v6 }
  0x3c   :  { %497 = vmatprep.subr.bf16.mxu0 %v620_v1  ;;  %521 = vmatprep.subr.bf16.mxu1 %v620_v1  ;;  %vm779_vm9 = vmand %vm77_vm5, %vm94_vm6 }
  0x3d   :  { %vm501_vm14 = vmpackc.low %vm779_vm9, %vm773_vm8 }
  0x3e   :  { %vm795_vm15 = vmand %vm78_vm10, %vm95_vm11 }
  0x3f   :  { %499 = vmatpush3.bf16.msk.msra.mxu0 %vm498_vm7, %v623_v13  ;;  %523 = vmatpush3.bf16.msk.msra.mxu1 %vm498_vm7, %v623_v13  ;;  %vm801_vm0 = vmand %vm79_vm12, %vm96_vm13  ;;  %vm304_vm13 = vcmask 27648  }
  0x40   :  { %500 = vmatprep.subr.bf16.mxu0 %v620_v1  ;;  %524 = vmatprep.subr.bf16.mxu1 %v620_v1  ;;  %vm504_vm5 = vmpackc.low %vm801_vm0, %vm795_vm15 }
  0x41   :  { %vm113_vm6 = vmand %vm80_vm1, %vm97_vm2 }
  0x42   :  { %vm114_vm7 = vmand %vm81_vm3, %vm98_vm4 }
  0x43   :  { %502 = vmatpush3.bf16.msk.msra.mxu0 %vm501_vm14, %v623_v13  ;;  %526 = vmatpush3.bf16.msk.msra.mxu1 %vm501_vm14, %v623_v13  ;;  %vm507_vm8 = vmpackc.low %vm114_vm7, %vm113_vm6 }
  0x44   :  { %503 = vmatprep.subr.bf16.mxu0 %v620_v1  ;;  %527 = vmatprep.subr.bf16.mxu1 %v620_v1 }
  0x47   :  { %505 = vmatpush3.bf16.msk.msra.mxu0 %vm504_vm5, %v623_v13  ;;  %529 = vmatpush3.bf16.msk.msra.mxu1 %vm504_vm5, %v623_v13 }
  0x48   :  { %506 = vmatprep.subr.bf16.mxu0 %v620_v1  ;;  %530 = vmatprep.subr.bf16.mxu1 %v620_v1 }
  0x4b   :  { %508 = vmatpush3.bf16.msk.msra.mxu0 %vm507_vm8, %v623_v13  ;;  %532 = vmatpush3.bf16.msk.msra.mxu1 %vm507_vm8, %v623_v13 }
  0x4e   :  { %448 = vmatmul.mubr.f32.vlgmr.msra.gmra.mrb[0].mxu0 %v44_v39  ;;  %483 = vmatmul.mubr.f32.vlgmr.msra.gmra.mrb[0].mxu1 %v45_v40 }
 0x121   :  { %v213_v41 = vpop.f32.mrb[0].mxu0  ;;  %v283_v42 = vpop.f32.mrb[0].mxu1 }
 0x122   :  { %542 = vrsqrt.f32 %v213_v41  ;;  %v449_v43 = vpop.f32.mrb[1].mxu0  ;;  %v484_v44 = vpop.f32.mrb[1].mxu1  ;;  %vm289_vm9 = vcmp.eq.f32.partialorder %v213_v41, inf  ;;  %v292_v48 = vand.u32 2147483648, %v213_v41  ;;  %vm291_vm10 = vcmp.eq.f32.partialorder %v213_v41, 0.0 }
 0x123   :  { %544 = vrsqrt.f32 %v283_v42  ;;  %vm296_vm11 = vcmp.eq.f32.partialorder %v283_v42, inf  ;;  %v299_v51 = vand.u32 2147483648, %v283_v42  ;;  %vm298_vm12 = vcmp.eq.f32.partialorder %v283_v42, 0.0 }
 0x12c   :  { %v543_v45 = vpop.eup %542 }
 0x12d   :  { %v545_v46 = vpop.eup %544  ;;  %v288_v47 = vmul.f32 %v543_v45, %v213_v41 }
 0x12e   :  { %v295_v49 = vmul.f32 %v545_v46, %v283_v42 }
 0x12f   :  { %v290_v50 = vsel %vm289_vm9, %v213_v41, %v288_v47 }
 0x130   :  { %v293_v52 = vsel %vm291_vm10, %v292_v48, %v290_v50  ;;  %v297_v53 = vsel %vm296_vm11, %v283_v42, %v295_v49 }
 0x131   :  { %v300_v54 = vsel %vm298_vm12, %v299_v51, %v297_v53 }
 0x132   :  { %v301_v55 = vsub.f32 %v293_v52, %v300_v54 }
 0x134   :  { %v302_v56 = vadd.f32 1.0, %v301_v55 }
 0x136   :  { %v303_v57 = vmax.f32 %v302_v56, 0.0 }
 0x138   :  { %v305_v58 = vsel %vm304_vm13, %v303_v57, 0.0 }
 0x139   :  { %306 = vadd.xlane.f32.xlu0 %v305_v58 }
 0x1c6   :  { %v307_v59 = vpop.xlane.xlu0 %306 }
 0x1c7   :  { %v308_v60 = vrot.slane %v307_v59, 4 }
 0x1c9   :  { %v309_v61 = vadd.f32 %v308_v60, %v307_v59 }
 0x1cb   :  { %v310_v62 = vrot.slane %v309_v61, 2 }
 0x1cd   :  { %v311_v63 = vadd.f32 %v310_v62, %v309_v61 }
 0x1cf   :  { %v312_v0 = vrot.slane %v311_v63, 1 }
 0x1d1   :  { %v313_v1 = vadd.f32 %v312_v0, %v311_v63 }
 0x1d3   :  { %533 = vpush %v313_v1 }
 0x204   :  { %s534_s10 = spop %533 }
 0x205   :  { %v315_v2 = vstv %s534_s10 }
 0x206   :  { %316 = vst [vmem:[#allocation7] sm:$0xff] %v315_v2 }
 0x207   :  { %601 = shalt.err (!%p598_p6)
}
 0x208   :  { %s602_s14 = scalar_lea.hbm %s841_s3, 128 }
 0x209   :  { %p603_p7 = scmp.ne.s32.totalorder %s841_s3, %s602_s14  ;;  %p606_p8 = scmp.lt.u32.totalorder %s602_s14, %s841_s3 }
 0x20b   :  { %p608_p9 = pnand %p606_p8, %p603_p7 }
 0x20d   :  { %611 = shalt.err (!%p608_p9)
}
 0x20e   :  { %326 = dma.vmem_to_hbm [thread:$0]  %s324_s9, 128, %s841_s3, [#allocation4]  }
 0x20f   :  { %616 = dma.done.wait [#allocation4], 128  }
 0x210   :  { %617 = vsyncadd [#allocation4], 4294967168 }
 0x211   :  { %330 = vsyncpa [#allocation3], 1 }
 0x212   :  { %331 = vsyncpa [#allocation6], 1 }
 0x213   :  { %332 = vsyncpa [#allocation4], 1 }

</bundles_post_ra>
